<compile_context>
chip_gen: v7x
topology: tpu7x:2x2x1
jax: 0.10.0
libtpu: 0.0.40
codegen_flags: <defaults>
</compile_context>

<pallas_src>
import functools

import jax
import jax.numpy as jnp
from jax.experimental import pallas as pl
from jax.experimental.pallas import tpu as pltpu

# ----------------------------- small config ---------------------------------
DIM = 128          # config.dim
N_HEADS = 4        # config.n_heads
N_KV_HEADS = 1     # config.n_kv_heads
HEAD_DIM = DIM // N_HEADS                 # 32
KV_HEAD_DIM = DIM // 4 // N_KV_HEADS      # 32 (reference formula)
ROPE_THETA = 500000.0
SEQ = 8
LANE = 128

_COMPILER_PARAMS = pltpu.CompilerParams(dimension_semantics=("arbitrary",))


def _vspec(shape):
    n = len(shape)
    return pl.BlockSpec(shape, lambda i, _n=n: (0,) * _n)


# ------------------------------- kernel --------------------------------------
def _attention_block_kernel(xn_ref, xu_ref, wqkv_ref, wo_ref,
                            cosq_ref, sinq_ref, cosk_ref, sink_ref,
                            o_ref, *, n_heads, head_dim, kv_hd,
                            k_off, ks_off, v_off):
    xn = xn_ref[...]                              # (S, D) f32
    xb = xn.astype(jnp.bfloat16)                  # bf16 MXU inputs, f32 accumulation
    s = xn.shape[0]
    qd = n_heads * head_dim
    scale = 1.0 / (head_dim ** 0.5)

    # --- one fused projection matmul: [Q | Q_pairswap | K | K_pairswap | V] ---
    proj = jnp.dot(xb, wqkv_ref[...], preferred_element_type=jnp.float32)  # (S, 640)
    q, qs = proj[:, :qd], proj[:, qd:2 * qd]               # (S, qd) each
    k = proj[:, k_off:k_off + kv_hd]                        # lane-aligned slices
    ks = proj[:, ks_off:ks_off + kv_hd]
    v = proj[:, v_off:v_off + kv_hd]

    # interleaved (complex) RoPE, pure VPU:
    #   out[2i]   = t[2i]*cos_i - t[2i+1]*sin_i
    #   out[2i+1] = t[2i+1]*cos_i + t[2i]*sin_i
    qr = q * cosq_ref[...] + qs * sinq_ref[...]             # all heads at once
    kr = k * cosk_ref[...] + ks * sink_ref[...]             # shared (n_kv_heads == 1)

    # causal mask (reference adds a -inf strict-upper-triangular mask)
    row = jax.lax.broadcasted_iota(jnp.int32, (s, s), 0)
    col = jax.lax.broadcasted_iota(jnp.int32, (s, s), 1)
    causal = col <= row

    cdims = (((1,), (1,)), ((), ()))   # qr_h @ kr.T (contract head_dim of both)
    parts = []
    for h in range(n_heads):
        qh = qr[:, h * head_dim:(h + 1) * head_dim]
        scores = jax.lax.dot_general(qh, kr, cdims,
                                     preferred_element_type=jnp.float32) * scale
        scores = jnp.where(causal, scores, -jnp.inf)
        m = jnp.max(scores, axis=-1, keepdims=True)
        p = jnp.exp(scores - m)                                           # f32 / EUP
        inv = pl.reciprocal(jnp.sum(p, axis=-1, keepdims=True), approx=True)
        parts.append(jnp.dot(p * inv, v, preferred_element_type=jnp.float32))

    stacked = jnp.concatenate(parts, axis=-1)                             # (S, D)
    delta = jnp.dot(stacked.astype(jnp.bfloat16), wo_ref[...],
                    preferred_element_type=jnp.float32)
    o_ref[...] = xu_ref[...] + delta


# ------------------------------- wrapper --------------------------------------
def attention_block(x_norm, x_unnorm, wq, wk, wv, wo, rope_theta=ROPE_THETA):
    s, d = x_norm.shape
    n_heads, hd, _ = wq.shape
    kv_hd = wk.shape[1]
    assert kv_hd == hd, "this config has head_dim == kv_head_dim"
    qd = n_heads * hd
    pad = ((kv_hd + LANE - 1) // LANE) * LANE     # lane-aligned K/KS/V section width

    # Pre-transposed, lane-dense, fused weights (free at init/trace time).
    swap_q = jnp.arange(qd) ^ 1                   # interleaved pair swap
    swap_k = jnp.arange(kv_hd) ^ 1
    wq_cat = jnp.transpose(wq, (2, 0, 1)).reshape(d, qd)   # x @ wq[h].T, all heads
    wk_t = wk[0].T
    wv_t = wv[0].T
    zpad = jnp.zeros((d, pad - kv_hd), dtype=jnp.float32)
    wqkv = jnp.concatenate(
        [wq_cat, wq_cat[:, swap_q],
         wk_t, zpad, wk_t[:, swap_k], zpad, wv_t, zpad], axis=1
    ).astype(jnp.bfloat16)                                  # (d, 2*qd + 3*pad)
    k_off, ks_off, v_off = 2 * qd, 2 * qd + pad, 2 * qd + 2 * pad
    wo_t = wo.T.astype(jnp.bfloat16)

    # RoPE tables (interleaved complex rotation).
    # TODO(synk): the reference hardcodes arange(64)/64; 64 == head_dim//2 only for
    # the 8B config, so this scaled-down config uses head_dim//2 instead.
    hd2 = hd // 2
    freqs = 1.0 / (rope_theta ** (jnp.arange(hd2, dtype=jnp.float32) / hd2))
    ang = jnp.outer(jnp.arange(s, dtype=jnp.float32), freqs)          # (S, hd2)
    cos_k = jnp.repeat(jnp.cos(ang), 2, axis=1)                       # (S, hd)
    sin_k = jnp.stack([-jnp.sin(ang), jnp.sin(ang)], axis=-1).reshape(s, hd)
    cos_q = jnp.tile(cos_k, (1, n_heads))                             # (S, qd)
    sin_q = jnp.tile(sin_k, (1, n_heads))

    kern = functools.partial(_attention_block_kernel, n_heads=n_heads, head_dim=hd,
                             kv_hd=kv_hd, k_off=k_off, ks_off=ks_off, v_off=v_off)
    args = (x_norm, x_unnorm, wqkv, wo_t, cos_q, sin_q, cos_k, sin_k)
    return pl.pallas_call(
        kern,
        out_shape=jax.ShapeDtypeStruct((s, d), jnp.float32),
        grid=(1,),
        in_specs=[_vspec(a.shape) for a in args],
        out_specs=_vspec((s, d)),
        compiler_params=_COMPILER_PARAMS,
    )(*args)


# --------------------- pure-JAX reference (spec semantics) -------------------
def attention_block_ref(x_norm, x_unnorm, wq, wk, wv, wo, rope_theta=ROPE_THETA):
    s = x_norm.shape[0]
    n_heads, hd, _ = wq.shape
    hd2 = hd // 2
    freqs = 1.0 / (rope_theta ** (jnp.arange(hd2, dtype=jnp.float32) / hd2))
    ang = jnp.outer(jnp.arange(s, dtype=jnp.float32), freqs)
    cos, sin = jnp.cos(ang), jnp.sin(ang)

    def rope(t):
        tp = t.reshape(s, -1, 2)
        a, b = tp[..., 0], tp[..., 1]
        return jnp.stack([a * cos - b * sin, a * sin + b * cos],
                         axis=-1).reshape(t.shape)

    mask = jnp.where(jnp.triu(jnp.ones((s, s), dtype=bool), k=1), -jnp.inf, 0.0)
    outs = []
    for h in range(n_heads):
        q = x_norm @ wq[h].T
        k = x_norm @ wk[h // 4].T
        v = x_norm @ wv[h // 4].T
        sc = rope(q) @ rope(k).T / (hd ** 0.5) + mask
        p = jax.nn.softmax(sc, axis=-1)
        outs.append(p @ v)
    return x_unnorm + jnp.concatenate(outs, axis=-1) @ wo.T


# ----------------------------------- main -------------------------------------
if __name__ == "__main__":
    key = jax.random.PRNGKey(0)
    kx, kq, kk, kv, ko = jax.random.split(key, 5)

    x_unnorm = jax.random.normal(kx, (SEQ, DIM), dtype=jnp.float32)
    # "token_embeddings" as the surrounding model would produce them (RMSNorm, w=1)
    x_norm = x_unnorm * jax.lax.rsqrt(
        jnp.mean(x_unnorm * x_unnorm, axis=-1, keepdims=True) + 1e-5)

    wq = 0.02 * jax.random.normal(kq, (N_HEADS, HEAD_DIM, DIM), dtype=jnp.float32)
    wk = 0.02 * jax.random.normal(kk, (N_KV_HEADS, KV_HEAD_DIM, DIM), dtype=jnp.float32)
    wv = 0.02 * jax.random.normal(kv, (N_KV_HEADS, KV_HEAD_DIM, DIM), dtype=jnp.float32)
    wo = 0.02 * jax.random.normal(ko, (DIM, DIM), dtype=jnp.float32)

    out = attention_block(x_norm, x_unnorm, wq, wk, wv, wo)
    out = jax.block_until_ready(out)

    ref = attention_block_ref(x_norm, x_unnorm, wq, wk, wv, wo)
    assert out.shape == (SEQ, DIM)
    assert jnp.allclose(out, ref, atol=2e-2, rtol=2e-2), \
        float(jnp.max(jnp.abs(out - ref)))
    print("KERNEL_OK")
</pallas_src>

<mosaic_0001>
module attributes {stable_mosaic.version = 11 : i64} {
  func.func @_attention_block_kernel(%arg0: i32, %arg1: memref<8x128xf32, #tpu.memory_space<vmem>>, %arg2: memref<8x128xf32, #tpu.memory_space<vmem>>, %arg3: memref<128x640xbf16, #tpu.memory_space<vmem>>, %arg4: memref<128x128xbf16, #tpu.memory_space<vmem>>, %arg5: memref<8x128xf32, #tpu.memory_space<vmem>>, %arg6: memref<8x128xf32, #tpu.memory_space<vmem>>, %arg7: memref<8x32xf32, #tpu.memory_space<vmem>>, %arg8: memref<8x32xf32, #tpu.memory_space<vmem>>, %arg9: memref<8x128xf32, #tpu.memory_space<vmem>>) attributes {dimension_semantics = [#tpu.dimension_semantics<arbitrary>], iteration_bounds = array<i64: 1>, scalar_prefetch = 0 : i64, scratch_operands = 0 : i64, tpu.core_type = #tpu.core_type<tc>, window_params = [{pipeline_mode = #tpu.pipeline_mode<synchronous>, transform_indices = @transform_0, window_bounds = array<i64: 8, 128>}, {pipeline_mode = #tpu.pipeline_mode<synchronous>, transform_indices = @transform_1, window_bounds = array<i64: 8, 128>}, {pipeline_mode = #tpu.pipeline_mode<synchronous>, transform_indices = @transform_2, window_bounds = array<i64: 128, 640>}, {pipeline_mode = #tpu.pipeline_mode<synchronous>, transform_indices = @transform_3, window_bounds = array<i64: 128, 128>}, {pipeline_mode = #tpu.pipeline_mode<synchronous>, transform_indices = @transform_4, window_bounds = array<i64: 8, 128>}, {pipeline_mode = #tpu.pipeline_mode<synchronous>, transform_indices = @transform_5, window_bounds = array<i64: 8, 128>}, {pipeline_mode = #tpu.pipeline_mode<synchronous>, transform_indices = @transform_6, window_bounds = array<i64: 8, 32>}, {pipeline_mode = #tpu.pipeline_mode<synchronous>, transform_indices = @transform_7, window_bounds = array<i64: 8, 32>}, {pipeline_mode = #tpu.pipeline_mode<synchronous>, transform_indices = @transform_8, window_bounds = array<i64: 8, 128>}]} {
    %c0 = arith.constant 0 : index
    %c0_0 = arith.constant 0 : index
    %0 = vector.load %arg1[%c0, %c0_0] : memref<8x128xf32, #tpu.memory_space<vmem>>, vector<8x128xf32>
    %1 = arith.truncf %0 : vector<8x128xf32> to vector<8x128xbf16>
    %c0_1 = arith.constant 0 : index
    %c0_2 = arith.constant 0 : index
    %2 = vector.load %arg3[%c0_1, %c0_2] : memref<128x640xbf16, #tpu.memory_space<vmem>>, vector<128x640xbf16>
    %cst = arith.constant dense<0.000000e+00> : vector<8x640xf32>
    %3 = tpu.matmul %1, %2, %cst {dimension_numbers = #tpu.dot_dimension_numbers<[1], [0], [0], [1], [0, 0, 1, 1], [], []>} : vector<8x128xbf16>, vector<128x640xbf16>, vector<8x640xf32> -> vector<8x640xf32>
    %4 = vector.extract_strided_slice %3 {offsets = [0, 0], sizes = [8, 128], strides = [1, 1]} : vector<8x640xf32> to vector<8x128xf32>
    %5 = vector.extract_strided_slice %3 {offsets = [0, 128], sizes = [8, 128], strides = [1, 1]} : vector<8x640xf32> to vector<8x128xf32>
    %6 = vector.extract_strided_slice %3 {offsets = [0, 256], sizes = [8, 32], strides = [1, 1]} : vector<8x640xf32> to vector<8x32xf32>
    %7 = vector.extract_strided_slice %3 {offsets = [0, 384], sizes = [8, 32], strides = [1, 1]} : vector<8x640xf32> to vector<8x32xf32>
    %8 = vector.extract_strided_slice %3 {offsets = [0, 512], sizes = [8, 32], strides = [1, 1]} : vector<8x640xf32> to vector<8x32xf32>
    %c0_3 = arith.constant 0 : index
    %c0_4 = arith.constant 0 : index
    %9 = vector.load %arg5[%c0_3, %c0_4] : memref<8x128xf32, #tpu.memory_space<vmem>>, vector<8x128xf32>
    %10 = arith.mulf %4, %9 : vector<8x128xf32>
    %c0_5 = arith.constant 0 : index
    %c0_6 = arith.constant 0 : index
    %11 = vector.load %arg6[%c0_5, %c0_6] : memref<8x128xf32, #tpu.memory_space<vmem>>, vector<8x128xf32>
    %12 = arith.mulf %5, %11 : vector<8x128xf32>
    %13 = arith.addf %10, %12 : vector<8x128xf32>
    %c0_7 = arith.constant 0 : index
    %c0_8 = arith.constant 0 : index
    %14 = vector.load %arg7[%c0_7, %c0_8] : memref<8x32xf32, #tpu.memory_space<vmem>>, vector<8x32xf32>
    %15 = arith.mulf %6, %14 : vector<8x32xf32>
    %c0_9 = arith.constant 0 : index
    %c0_10 = arith.constant 0 : index
    %16 = vector.load %arg8[%c0_9, %c0_10] : memref<8x32xf32, #tpu.memory_space<vmem>>, vector<8x32xf32>
    %17 = arith.mulf %7, %16 : vector<8x32xf32>
    %18 = arith.addf %15, %17 : vector<8x32xf32>
    %19 = tpu.iota {dimensions = array<i32: 0>} : vector<8x8xi32>
    %20 = tpu.iota {dimensions = array<i32: 1>} : vector<8x8xi32>
    %21 = arith.cmpi sle, %20, %19 : vector<8x8xi32>
    %22 = vector.extract_strided_slice %13 {offsets = [0, 0], sizes = [8, 32], strides = [1, 1]} : vector<8x128xf32> to vector<8x32xf32>
    %cst_11 = arith.constant dense<0.000000e+00> : vector<8x8xf32>
    %23 = tpu.matmul %22, %18, %cst_11 {dimension_numbers = #tpu.dot_dimension_numbers<[1], [1], [0], [0], [0, 0, 1, 0], [], []>} : vector<8x32xf32>, vector<8x32xf32>, vector<8x8xf32> -> vector<8x8xf32>
    %cst_12 = arith.constant 0.176776692 : f32
    %24 = vector.broadcast %cst_12 : f32 to vector<8x8xf32>
    %25 = arith.mulf %23, %24 : vector<8x8xf32>
    %cst_13 = arith.constant 0xFF800000 : f32
    %26 = vector.broadcast %cst_13 : f32 to vector<8x8xf32>
    %27 = arith.select %21, %25, %26 : vector<8x8xi1>, vector<8x8xf32>
    %cst_14 = arith.constant dense<0xFF800000> : vector<8xf32>
    %28 = vector.multi_reduction <maximumf>, %27, %cst_14 [1] : vector<8x8xf32> to vector<8xf32>
    %29 = vector.shape_cast %28 : vector<8xf32> to vector<8x1xf32>
    %30 = vector.broadcast %29 : vector<8x1xf32> to vector<8x8xf32>
    %31 = arith.subf %27, %30 : vector<8x8xf32>
    %32 = math.exp %31 : vector<8x8xf32>
    %cst_15 = arith.constant dense<0.000000e+00> : vector<8xf32>
    %33 = vector.multi_reduction <add>, %32, %cst_15 [1] : vector<8x8xf32> to vector<8xf32>
    %34 = vector.shape_cast %33 : vector<8xf32> to vector<8x1xf32>
    %35 = tpu.reciprocal %34 {approx = true} : vector<8x1xf32> -> vector<8x1xf32>
    %36 = vector.broadcast %35 : vector<8x1xf32> to vector<8x8xf32>
    %37 = arith.mulf %32, %36 : vector<8x8xf32>
    %cst_16 = arith.constant dense<0.000000e+00> : vector<8x32xf32>
    %38 = tpu.matmul %37, %8, %cst_16 {dimension_numbers = #tpu.dot_dimension_numbers<[1], [0], [0], [1], [0, 0, 1, 1], [], []>} : vector<8x8xf32>, vector<8x32xf32>, vector<8x32xf32> -> vector<8x32xf32>
    %39 = vector.extract_strided_slice %13 {offsets = [0, 32], sizes = [8, 32], strides = [1, 1]} : vector<8x128xf32> to vector<8x32xf32>
    %cst_17 = arith.constant dense<0.000000e+00> : vector<8x8xf32>
    %40 = tpu.matmul %39, %18, %cst_17 {dimension_numbers = #tpu.dot_dimension_numbers<[1], [1], [0], [0], [0, 0, 1, 0], [], []>} : vector<8x32xf32>, vector<8x32xf32>, vector<8x8xf32> -> vector<8x8xf32>
    %cst_18 = arith.constant 0.176776692 : f32
    %41 = vector.broadcast %cst_18 : f32 to vector<8x8xf32>
    %42 = arith.mulf %40, %41 : vector<8x8xf32>
    %cst_19 = arith.constant 0xFF800000 : f32
    %43 = vector.broadcast %cst_19 : f32 to vector<8x8xf32>
    %44 = arith.select %21, %42, %43 : vector<8x8xi1>, vector<8x8xf32>
    %cst_20 = arith.constant dense<0xFF800000> : vector<8xf32>
    %45 = vector.multi_reduction <maximumf>, %44, %cst_20 [1] : vector<8x8xf32> to vector<8xf32>
    %46 = vector.shape_cast %45 : vector<8xf32> to vector<8x1xf32>
    %47 = vector.broadcast %46 : vector<8x1xf32> to vector<8x8xf32>
    %48 = arith.subf %44, %47 : vector<8x8xf32>
    %49 = math.exp %48 : vector<8x8xf32>
    %cst_21 = arith.constant dense<0.000000e+00> : vector<8xf32>
    %50 = vector.multi_reduction <add>, %49, %cst_21 [1] : vector<8x8xf32> to vector<8xf32>
    %51 = vector.shape_cast %50 : vector<8xf32> to vector<8x1xf32>
    %52 = tpu.reciprocal %51 {approx = true} : vector<8x1xf32> -> vector<8x1xf32>
    %53 = vector.broadcast %52 : vector<8x1xf32> to vector<8x8xf32>
    %54 = arith.mulf %49, %53 : vector<8x8xf32>
    %cst_22 = arith.constant dense<0.000000e+00> : vector<8x32xf32>
    %55 = tpu.matmul %54, %8, %cst_22 {dimension_numbers = #tpu.dot_dimension_numbers<[1], [0], [0], [1], [0, 0, 1, 1], [], []>} : vector<8x8xf32>, vector<8x32xf32>, vector<8x32xf32> -> vector<8x32xf32>
    %56 = vector.extract_strided_slice %13 {offsets = [0, 64], sizes = [8, 32], strides = [1, 1]} : vector<8x128xf32> to vector<8x32xf32>
    %cst_23 = arith.constant dense<0.000000e+00> : vector<8x8xf32>
    %57 = tpu.matmul %56, %18, %cst_23 {dimension_numbers = #tpu.dot_dimension_numbers<[1], [1], [0], [0], [0, 0, 1, 0], [], []>} : vector<8x32xf32>, vector<8x32xf32>, vector<8x8xf32> -> vector<8x8xf32>
    %cst_24 = arith.constant 0.176776692 : f32
    %58 = vector.broadcast %cst_24 : f32 to vector<8x8xf32>
    %59 = arith.mulf %57, %58 : vector<8x8xf32>
    %cst_25 = arith.constant 0xFF800000 : f32
    %60 = vector.broadcast %cst_25 : f32 to vector<8x8xf32>
    %61 = arith.select %21, %59, %60 : vector<8x8xi1>, vector<8x8xf32>
    %cst_26 = arith.constant dense<0xFF800000> : vector<8xf32>
    %62 = vector.multi_reduction <maximumf>, %61, %cst_26 [1] : vector<8x8xf32> to vector<8xf32>
    %63 = vector.shape_cast %62 : vector<8xf32> to vector<8x1xf32>
    %64 = vector.broadcast %63 : vector<8x1xf32> to vector<8x8xf32>
    %65 = arith.subf %61, %64 : vector<8x8xf32>
    %66 = math.exp %65 : vector<8x8xf32>
    %cst_27 = arith.constant dense<0.000000e+00> : vector<8xf32>
    %67 = vector.multi_reduction <add>, %66, %cst_27 [1] : vector<8x8xf32> to vector<8xf32>
    %68 = vector.shape_cast %67 : vector<8xf32> to vector<8x1xf32>
    %69 = tpu.reciprocal %68 {approx = true} : vector<8x1xf32> -> vector<8x1xf32>
    %70 = vector.broadcast %69 : vector<8x1xf32> to vector<8x8xf32>
    %71 = arith.mulf %66, %70 : vector<8x8xf32>
    %cst_28 = arith.constant dense<0.000000e+00> : vector<8x32xf32>
    %72 = tpu.matmul %71, %8, %cst_28 {dimension_numbers = #tpu.dot_dimension_numbers<[1], [0], [0], [1], [0, 0, 1, 1], [], []>} : vector<8x8xf32>, vector<8x32xf32>, vector<8x32xf32> -> vector<8x32xf32>
    %73 = vector.extract_strided_slice %13 {offsets = [0, 96], sizes = [8, 32], strides = [1, 1]} : vector<8x128xf32> to vector<8x32xf32>
    %cst_29 = arith.constant dense<0.000000e+00> : vector<8x8xf32>
    %74 = tpu.matmul %73, %18, %cst_29 {dimension_numbers = #tpu.dot_dimension_numbers<[1], [1], [0], [0], [0, 0, 1, 0], [], []>} : vector<8x32xf32>, vector<8x32xf32>, vector<8x8xf32> -> vector<8x8xf32>
    %cst_30 = arith.constant 0.176776692 : f32
    %75 = vector.broadcast %cst_30 : f32 to vector<8x8xf32>
    %76 = arith.mulf %74, %75 : vector<8x8xf32>
    %cst_31 = arith.constant 0xFF800000 : f32
    %77 = vector.broadcast %cst_31 : f32 to vector<8x8xf32>
    %78 = arith.select %21, %76, %77 : vector<8x8xi1>, vector<8x8xf32>
    %cst_32 = arith.constant dense<0xFF800000> : vector<8xf32>
    %79 = vector.multi_reduction <maximumf>, %78, %cst_32 [1] : vector<8x8xf32> to vector<8xf32>
    %80 = vector.shape_cast %79 : vector<8xf32> to vector<8x1xf32>
    %81 = vector.broadcast %80 : vector<8x1xf32> to vector<8x8xf32>
    %82 = arith.subf %78, %81 : vector<8x8xf32>
    %83 = math.exp %82 : vector<8x8xf32>
    %cst_33 = arith.constant dense<0.000000e+00> : vector<8xf32>
    %84 = vector.multi_reduction <add>, %83, %cst_33 [1] : vector<8x8xf32> to vector<8xf32>
    %85 = vector.shape_cast %84 : vector<8xf32> to vector<8x1xf32>
    %86 = tpu.reciprocal %85 {approx = true} : vector<8x1xf32> -> vector<8x1xf32>
    %87 = vector.broadcast %86 : vector<8x1xf32> to vector<8x8xf32>
    %88 = arith.mulf %83, %87 : vector<8x8xf32>
    %cst_34 = arith.constant dense<0.000000e+00> : vector<8x32xf32>
    %89 = tpu.matmul %88, %8, %cst_34 {dimension_numbers = #tpu.dot_dimension_numbers<[1], [0], [0], [1], [0, 0, 1, 1], [], []>} : vector<8x8xf32>, vector<8x32xf32>, vector<8x32xf32> -> vector<8x32xf32>
    %90 = tpu.concatenate %38, %55, %72, %89 in 1 : vector<8x32xf32>, vector<8x32xf32>, vector<8x32xf32>, vector<8x32xf32> -> vector<8x128xf32>
    %91 = arith.truncf %90 : vector<8x128xf32> to vector<8x128xbf16>
    %c0_35 = arith.constant 0 : index
    %c0_36 = arith.constant 0 : index
    %92 = vector.load %arg4[%c0_35, %c0_36] : memref<128x128xbf16, #tpu.memory_space<vmem>>, vector<128x128xbf16>
    %cst_37 = arith.constant dense<0.000000e+00> : vector<8x128xf32>
    %93 = tpu.matmul %91, %92, %cst_37 {dimension_numbers = #tpu.dot_dimension_numbers<[1], [0], [0], [1], [0, 0, 1, 1], [], []>} : vector<8x128xbf16>, vector<128x128xbf16>, vector<8x128xf32> -> vector<8x128xf32>
    %c0_38 = arith.constant 0 : index
    %c0_39 = arith.constant 0 : index
    %94 = vector.load %arg2[%c0_38, %c0_39] : memref<8x128xf32, #tpu.memory_space<vmem>>, vector<8x128xf32>
    %95 = arith.addf %94, %93 : vector<8x128xf32>
    %c0_40 = arith.constant 0 : index
    %c0_41 = arith.constant 0 : index
    %96 = vector.load %arg9[%c0_40, %c0_41] : memref<8x128xf32, #tpu.memory_space<vmem>>, vector<8x128xf32>
    tpu.vector_store %arg9[%c0_40, %c0_41], %95 {strides = array<i32>} : memref<8x128xf32, #tpu.memory_space<vmem>>, vector<8x128xf32>,
    return
  }
  func.func @transform_0(%arg0: i32) -> (i32, i32) {
    %c0_i32 = arith.constant 0 : i32
    %c0_i32_0 = arith.constant 0 : i32
    %c0_i32_1 = arith.constant 0 : i32
    return %c0_i32, %c0_i32_0 : i32, i32
  }
  func.func @transform_1(%arg0: i32) -> (i32, i32) {
    %c0_i32 = arith.constant 0 : i32
    %c0_i32_0 = arith.constant 0 : i32
    %c0_i32_1 = arith.constant 0 : i32
    return %c0_i32, %c0_i32_0 : i32, i32
  }
  func.func @transform_2(%arg0: i32) -> (i32, i32) {
    %c0_i32 = arith.constant 0 : i32
    %c0_i32_0 = arith.constant 0 : i32
    %c0_i32_1 = arith.constant 0 : i32
    return %c0_i32, %c0_i32_0 : i32, i32
  }
  func.func @transform_3(%arg0: i32) -> (i32, i32) {
    %c0_i32 = arith.constant 0 : i32
    %c0_i32_0 = arith.constant 0 : i32
    %c0_i32_1 = arith.constant 0 : i32
    return %c0_i32, %c0_i32_0 : i32, i32
  }
  func.func @transform_4(%arg0: i32) -> (i32, i32) {
    %c0_i32 = arith.constant 0 : i32
    %c0_i32_0 = arith.constant 0 : i32
    %c0_i32_1 = arith.constant 0 : i32
    return %c0_i32, %c0_i32_0 : i32, i32
  }
  func.func @transform_5(%arg0: i32) -> (i32, i32) {
    %c0_i32 = arith.constant 0 : i32
    %c0_i32_0 = arith.constant 0 : i32
    %c0_i32_1 = arith.constant 0 : i32
    return %c0_i32, %c0_i32_0 : i32, i32
  }
  func.func @transform_6(%arg0: i32) -> (i32, i32) {
    %c0_i32 = arith.constant 0 : i32
    %c0_i32_0 = arith.constant 0 : i32
    %c0_i32_1 = arith.constant 0 : i32
    return %c0_i32, %c0_i32_0 : i32, i32
  }
  func.func @transform_7(%arg0: i32) -> (i32, i32) {
    %c0_i32 = arith.constant 0 : i32
    %c0_i32_0 = arith.constant 0 : i32
    %c0_i32_1 = arith.constant 0 : i32
    return %c0_i32, %c0_i32_0 : i32, i32
  }
  func.func @transform_8(%arg0: i32) -> (i32, i32) {
    %c0_i32 = arith.constant 0 : i32
    %c0_i32_0 = arith.constant 0 : i32
    %c0_i32_1 = arith.constant 0 : i32
    return %c0_i32, %c0_i32_0 : i32, i32
  }
}

</mosaic_0001>

<bundles_post_ra>
// kernel: tpu_custom_call.1
= control target key start
LH: loop header
LB: loop body
LE: loop exit
PB: predicated region body
PF: predicated region fallthrough
CT: control target
= control target key end

     0   :  { %13 = vsyncpa [#allocation3], 0  ;;  %s1948_s0 = inlined_call_operand.hbm [shape: f32[8,128], index: 0, kind: input, shape index: {}]   ;;  %s1949_s1 = inlined_call_operand.hbm [shape: f32[8,128], index: 1, kind: input, shape index: {}]   ;;  %s1950_s2 = inlined_call_operand.hbm [shape: bf16[128,640], index: 2, kind: input, shape index: {}]   ;;  %s1951_s3 = inlined_call_operand.hbm [shape: bf16[128,128], index: 3, kind: input, shape index: {}]   ;;  %s1952_s4 = inlined_call_operand.vmem [shape: f32[8,128], index: 4, kind: input, shape index: {}]   ;;  %s1953_s5 = inlined_call_operand.vmem [shape: f32[8,128], index: 5, kind: input, shape index: {}]   ;;  %s1954_s6 = inlined_call_operand.hbm [shape: f32[8,32], index: 6, kind: input, shape index: {}]   ;;  %s1955_s7 = inlined_call_operand.vmem [shape: f32[8,32], index: 7, kind: input, shape index: {}]   ;;  %s1956_s8 = inlined_call_operand.hbm [shape: f32[8,128], index: 8, kind: output, shape index: {}]  }
   0x1   :  { %14 = vsyncpa [#allocation6], 0 }
   0x2   :  { %15 = vsyncpa [#allocation9], 0 }
   0x3   :  { %16 = vsyncpa [#allocation4], 0  ;;  %s1683_s27 = smov [#allocation5]   ;;  %s1684_s29 = smov [#allocation8]  }
   0x4   :  { %s33_s28 = sshll.u32 %s1683_s27, 4  ;;  %s54_s30 = sshll.u32 %s1684_s29, 4  ;;  %s34_s28 = int_to_ptr.vmem [resolvable:$true] %s33_s28  ;;  %s1743_s30 = int_to_ptr.vmem [resolvable:$true] %s54_s30 }
   0x5   :  { %s1543_s11 = scalar_lea.hbm %s1949_s1, 128 }
   0x6   :  { %p1544_p0 = scmp.ne.s32.totalorder %s1949_s1, %s1543_s11  ;;  %p1547_p1 = scmp.lt.u32.totalorder %s1543_s11, %s1949_s1 }
   0x8   :  { %p1549_p2 = pnand %p1547_p1, %p1544_p0 }
   0xa   :  { %1552 = shalt.err (!%p1549_p2)
}
   0xb   :  { %s1553_s16 = scalar_lea.vmem %s34_s28, 128  ;;  %p1558_p4 = scmp.lt.s32.totalorder %s34_s28, %s34_s28 }
   0xc   :  { %p1554_p3 = scmp.ne.s32.totalorder %s34_s28, %s1553_s16  ;;  %p1559_p5 = scmp.lt.s32.totalorder %s1553_s16, %s1553_s16 }
   0xe   :  { %p1560_p6 = por %p1559_p5, %p1558_p4 }
  0x10   :  { %p1561_p7 = pnand %p1560_p6, %p1554_p3 }
  0x12   :  { %1564 = shalt.err (!%p1561_p7)
}
  0x13   :  { %36 = dma.hbm_to_vmem [thread:$0]  %s1949_s1, 128, %s34_s28, [#allocation6]  }
  0x14   :  { %s1565_s21 = scalar_lea.hbm %s1951_s3, 1024 }
  0x15   :  { %p1566_p8 = scmp.ne.s32.totalorder %s1951_s3, %s1565_s21  ;;  %p1569_p9 = scmp.lt.u32.totalorder %s1565_s21, %s1951_s3 }
  0x17   :  { %p1571_p10 = pnand %p1569_p9, %p1566_p8 }
  0x19   :  { %1574 = shalt.err (!%p1571_p10)
}
  0x1a   :  { %s1575_s26 = scalar_lea.vmem %s1743_s30, 1024  ;;  %p1580_p12 = scmp.lt.s32.totalorder %s1743_s30, %s1743_s30 }
  0x1b   :  { %p1576_p11 = scmp.ne.s32.totalorder %s1743_s30, %s1575_s26  ;;  %p1581_p13 = scmp.lt.s32.totalorder %s1575_s26, %s1575_s26 }
  0x1d   :  { %p1582_p0 = por %p1581_p13, %p1580_p12 }
  0x1f   :  { %p1583_p1 = pnand %p1582_p0, %p1576_p11 }
  0x21   :  { %1586 = shalt.err (!%p1583_p1)
}
  0x22   :  { %s1685_s1 = smov 64   ;;  %s1686_s27 = smov 4  }
  0x23   :  { %60 = dma.hbm_to_vmem [thread:$0]  %s1951_s3, 1024, %s1743_s30, [#allocation9], %s1685_s1, %s1685_s1, %s1686_s27  }
  0x24   :  { %s1687_s9 = smov [#allocation2]   ;;  %s1688_s11 = smov [#allocation7]  }
  0x25   :  { %s23_s10 = sshll.u32 %s1687_s9, 4  ;;  %s42_s12 = sshll.u32 %s1688_s11, 4  ;;  %s24_s10 = int_to_ptr.vmem [resolvable:$true] %s23_s10  ;;  %s1776_s12 = int_to_ptr.vmem [resolvable:$true] %s42_s12 }
  0x26   :  { %s1587_s15 = scalar_lea.hbm %s1948_s0, 128 }
  0x27   :  { %p1588_p2 = scmp.ne.s32.totalorder %s1948_s0, %s1587_s15  ;;  %p1591_p3 = scmp.lt.u32.totalorder %s1587_s15, %s1948_s0 }
  0x29   :  { %p1593_p4 = pnand %p1591_p3, %p1588_p2 }
  0x2b   :  { %1596 = shalt.err (!%p1593_p4)
}
  0x2c   :  { %s1597_s3 = scalar_lea.vmem %s24_s10, 128  ;;  %p1602_p6 = scmp.lt.s32.totalorder %s24_s10, %s24_s10 }
  0x2d   :  { %p1598_p5 = scmp.ne.s32.totalorder %s24_s10, %s1597_s3  ;;  %p1603_p7 = scmp.lt.s32.totalorder %s1597_s3, %s1597_s3 }
  0x2f   :  { %p1604_p8 = por %p1603_p7, %p1602_p6 }
  0x31   :  { %p1605_p9 = pnand %p1604_p8, %p1598_p5 }
  0x33   :  { %1608 = shalt.err (!%p1605_p9)
}
  0x34   :  { %26 = dma.hbm_to_vmem [thread:$0]  %s1948_s0, 128, %s24_s10, [#allocation3]  }
  0x35   :  { %s1609_s23 = scalar_lea.hbm %s1950_s2, 5120 }
  0x36   :  { %p1610_p10 = scmp.ne.s32.totalorder %s1950_s2, %s1609_s23  ;;  %p1613_p11 = scmp.lt.u32.totalorder %s1609_s23, %s1950_s2 }
  0x38   :  { %p1615_p12 = pnand %p1613_p11, %p1610_p10 }
  0x3a   :  { %1618 = shalt.err (!%p1615_p12)
}
  0x3b   :  { %s1619_s28 = scalar_lea.vmem %s1776_s12, 5120  ;;  %p1624_p0 = scmp.lt.s32.totalorder %s1776_s12, %s1776_s12 }
  0x3c   :  { %p1620_p13 = scmp.ne.s32.totalorder %s1776_s12, %s1619_s28  ;;  %p1625_p1 = scmp.lt.s32.totalorder %s1619_s28, %s1619_s28 }
  0x3e   :  { %p1626_p2 = por %p1625_p1, %p1624_p0 }
  0x40   :  { %p1627_p3 = pnand %p1626_p2, %p1620_p13 }
  0x42   :  { %1630 = shalt.err (!%p1627_p3)
}
  0x43   :  { %s1689_s0 = smov 320   ;;  %s1690_s29 = smov 20  }
  0x44   :  { %48 = dma.hbm_to_vmem [thread:$0]  %s1950_s2, 5120, %s1776_s12, [#allocation6], %s1689_s0, %s1689_s0, %s1690_s29  }
  0x45   :  { %s1691_s11 = smov [#allocation10]   ;;  %s1631_s16 = scalar_lea.hbm %s1954_s6, 128 }
  0x46   :  { %s71_s13 = sshll.u32 %s1691_s11, 4  ;;  %p1632_p4 = scmp.ne.s32.totalorder %s1954_s6, %s1631_s16  ;;  %s72_s13 = int_to_ptr.vmem [resolvable:$true] %s71_s13 }
  0x47   :  { %p1635_p5 = scmp.lt.u32.totalorder %s1631_s16, %s1954_s6 }
  0x49   :  { %p1637_p6 = pnand %p1635_p5, %p1632_p4 }
  0x4b   :  { %1640 = shalt.err (!%p1637_p6)
}
  0x4c   :  { %s1641_s30 = scalar_lea.vmem %s72_s13, 128  ;;  %p1646_p8 = scmp.lt.s32.totalorder %s72_s13, %s72_s13 }
  0x4d   :  { %p1642_p7 = scmp.ne.s32.totalorder %s72_s13, %s1641_s30  ;;  %p1647_p9 = scmp.lt.s32.totalorder %s1641_s30, %s1641_s30 }
  0x4f   :  { %p1648_p10 = por %p1647_p9, %p1646_p8 }
  0x51   :  { %p1649_p11 = pnand %p1648_p10, %p1642_p7 }
  0x53   :  { %1652 = shalt.err (!%p1649_p11)
}
  0x54   :  { %74 = dma.hbm_to_vmem [thread:$0]  %s1954_s6, 128, %s72_s13, [#allocation9]  }
  0x55   :  { %1675 = dma.done.wait [#allocation3], 128  }
  0x56   :  { %1676 = vsyncadd [#allocation3], 4294967168 }
  0x57   :  { %1677 = dma.done.wait [#allocation6], 5248  }
  0x58   :  { %1678 = vsyncadd [#allocation6], 4294962048 }
  0x59   :  { %1679 = dma.done.wait [#allocation9], 1152  }
  0x5a   :  { %1680 = vsyncadd [#allocation9], 4294966144  ;;  %v1692_v0 = vmov 0   ;;  %v1463_v1 = vld [vmem:[#allocation7 + $0xc] ss:$20 sps:$4 sm:$0xff]   ;;  %v93_v32 = vld [vmem:[#allocation2] sm:$0xff]  ;;  %v483_v62 = vlaneseq }
  0x5b   :  { %424 = vmatprep.mubr.bf16.mxu1 %v1692_v0  ;;  %383 = vmatprep.mubr.bf16.mxu0 %v1692_v0  ;;  %v1465_v2 = vld [vmem:[#allocation7 + $0x8] ss:$20 sps:$4 sm:$0xff]   ;;  %v1466_v3 = vld [vmem:[#allocation7 + $0x4] ss:$20 sps:$4 sm:$0xff]   ;;  %v1468_v4 = vld [vmem:[#allocation7] ss:$20 sps:$4 sm:$0xff]   ;;  %v94_v34 = vpack.c.bf16 %v93_v32, %v93_v32 }
  0x5c   :  { %392 = vmatprep.subr.bf16.mxu1 %v1463_v1  ;;  %v1469_v5 = vld [vmem:[#allocation7 + $0x34] ss:$20 sps:$4 sm:$0xff]   ;;  %v1471_v6 = vld [vmem:[#allocation7 + $0x30] ss:$20 sps:$4 sm:$0xff]   ;;  %351 = vmatprep.subr.bf16.mxu0 %v1466_v3  ;;  %v1472_v7 = vld [vmem:[#allocation7 + $0x2c] ss:$20 sps:$4 sm:$0xff]  }
  0x5d   :  { %393 = vmatpush1.bf16.msra.mxu1 %v1465_v2  ;;  %352 = vmatpush1.bf16.msra.mxu0 %v1468_v4  ;;  %v1474_v8 = vld [vmem:[#allocation7 + $0x28] ss:$20 sps:$4 sm:$0xff]   ;;  %v1477_v10 = vld [vmem:[#allocation7 + $0x58] ss:$20 sps:$4 sm:$0xff]   ;;  %v1480_v13 = vld [vmem:[#allocation7 + $0x50] ss:$20 sps:$4 sm:$0xff]  }
  0x5e   :  { %394 = vmatprep.subr.bf16.mxu1 %v1469_v5  ;;  %353 = vmatprep.subr.bf16.mxu0 %v1472_v7  ;;  %v1475_v9 = vld [vmem:[#allocation7 + $0x5c] ss:$20 sps:$4 sm:$0xff]   ;;  %v1478_v11 = vld [vmem:[#allocation7 + $0x54] ss:$20 sps:$4 sm:$0xff]   ;;  %v1481_v12 = vld [vmem:[#allocation7 + $0x84] ss:$20 sps:$4 sm:$0xff]  }
  0x5f   :  { %v1484_v14 = vld [vmem:[#allocation7 + $0x7c] ss:$20 sps:$4 sm:$0xff]   ;;  %v1483_v15 = vld [vmem:[#allocation7 + $0x80] ss:$20 sps:$4 sm:$0xff]   ;;  %v1486_v17 = vld [vmem:[#allocation7 + $0x78] ss:$20 sps:$4 sm:$0xff]  }
  0x60   :  { %v1487_v16 = vld [vmem:[#allocation7 + $0xac] ss:$20 sps:$4 sm:$0xff]   ;;  %v1490_v18 = vld [vmem:[#allocation7 + $0xa4] ss:$20 sps:$4 sm:$0xff]   ;;  %v1489_v19 = vld [vmem:[#allocation7 + $0xa8] ss:$20 sps:$4 sm:$0xff]  }
  0x61   :  { %395 = vmatpush1.bf16.msra.mxu1 %v1471_v6  ;;  %354 = vmatpush1.bf16.msra.mxu0 %v1474_v8  ;;  %v1493_v20 = vld [vmem:[#allocation7 + $0xd4] ss:$20 sps:$4 sm:$0xff]   ;;  %v1496_v22 = vld [vmem:[#allocation7 + $0xcc] ss:$20 sps:$4 sm:$0xff]   ;;  %v1495_v23 = vld [vmem:[#allocation7 + $0xd0] ss:$20 sps:$4 sm:$0xff]  }
  0x62   :  { %396 = vmatprep.subr.bf16.mxu1 %v1475_v9  ;;  %355 = vmatprep.subr.bf16.mxu0 %v1478_v11  ;;  %v1492_v21 = vld [vmem:[#allocation7 + $0xa0] ss:$20 sps:$4 sm:$0xff]   ;;  %v1498_v24 = vld [vmem:[#allocation7 + $0xc8] ss:$20 sps:$4 sm:$0xff]   ;;  %v1501_v26 = vld [vmem:[#allocation7 + $0xf8] ss:$20 sps:$4 sm:$0xff]  }
  0x63   :  { %v1499_v25 = vld [vmem:[#allocation7 + $0xfc] ss:$20 sps:$4 sm:$0xff]   ;;  %v1502_v27 = vld [vmem:[#allocation7 + $0xf4] ss:$20 sps:$4 sm:$0xff]   ;;  %v1505_v28 = vld [vmem:[#allocation7 + $0x124] ss:$20 sps:$4 sm:$0xff]  }
  0x64   :  { %v1504_v29 = vld [vmem:[#allocation7 + $0xf0] ss:$20 sps:$4 sm:$0xff]   ;;  %v1507_v31 = vld [vmem:[#allocation7 + $0x120] ss:$20 sps:$4 sm:$0xff]   ;;  %v1510_v33 = vld [vmem:[#allocation7 + $0x118] ss:$20 sps:$4 sm:$0xff]  }
  0x65   :  { %397 = vmatpush1.bf16.msra.mxu1 %v1477_v10  ;;  %356 = vmatpush1.bf16.msra.mxu0 %v1480_v13  ;;  %v1508_v30 = vld [vmem:[#allocation7 + $0x11c] ss:$20 sps:$4 sm:$0xff]   ;;  %v1693_v35 = vmov 0.0   ;;  %vm1694_vm0 = vmmov 0   ;;  %v478_v36 = vld [vmem:[#allocation10] sm:$0xff]  ;;  %vm488_vm1 = vcmask 261120  }
  0x66   :  { %398 = vmatprep.subr.bf16.mxu1 %v1481_v12  ;;  %357 = vmatprep.subr.bf16.mxu0 %v1484_v14  ;;  %v480_v37 = vld [vmem:[%s1955_s7] sm:$0xff]  ;;  %v1512_v55 = vld [vmem:[#allocation7 + $0x38] ss:$20 sps:$4 sm:$0xff]   ;;  %v1514_v57 = vld [vmem:[#allocation7 + $0x88] ss:$20 sps:$4 sm:$0xff]   ;;  %v1857_v63 = vshrl.u32 %v483_v62, 7 }
  0x67   :  { %v473_v39 = vld [vmem:[%s1952_s4] sm:$0xff]  ;;  %s1695_s4 = smov 96   ;;  %v1516_v59 = vld [vmem:[#allocation7 + $0xd8] ss:$20 sps:$4 sm:$0xff]   ;;  %v1518_v61 = vld [vmem:[#allocation7 + $0x128] ss:$20 sps:$4 sm:$0xff]  }
  0x68   :  { %v475_v42 = vld [vmem:[%s1953_s5] sm:$0xff]  ;;  %v1859_v0 = vand.u32 127, %v483_v62  ;;  %vm567_vm3 = vcmask 64512   ;;  %s1696_s5 = smov 32   ;;  %vm1145_vm4 = vcmask 523264   ;;  %vm1147_vm5 = vcmask 785408  }
  0x69   :  { %399 = vmatpush1.bf16.msra.mxu1 %v1483_v15  ;;  %358 = vmatpush1.bf16.msra.mxu0 %v1486_v17  ;;  %v1511_v54 = vld [vmem:[#allocation7 + $0x10] ss:$20 sps:$4 sm:$0xff]   ;;  %v1513_v56 = vld [vmem:[#allocation7 + $0x60] ss:$20 sps:$4 sm:$0xff]   ;;  %s1697_s7 = smov [#allocation11]  }
  0x6a   :  { %400 = vmatprep.subr.bf16.mxu1 %v1487_v16  ;;  %359 = vmatprep.subr.bf16.mxu0 %v1490_v18  ;;  %v1515_v58 = vld [vmem:[#allocation7 + $0xb0] ss:$20 sps:$4 sm:$0xff]   ;;  %v1517_v60 = vld [vmem:[#allocation7 + $0x100] ss:$20 sps:$4 sm:$0xff]   ;;  %vm487_vm2 = vcmp.le.s32.totalorder %v1859_v0, %v1857_v63  ;;  %v1520_v0 = vld [vmem:[#allocation8 + $0x8] sm:$0xff]  }
  0x6b   :  { %v1519_v63 = vld [vmem:[#allocation8] sm:$0xff]  }
  0x6d   :  { %401 = vmatpush1.bf16.msra.mxu1 %v1489_v19  ;;  %360 = vmatpush1.bf16.msra.mxu0 %v1492_v21 }
  0x6e   :  { %402 = vmatprep.subr.bf16.mxu1 %v1493_v20  ;;  %361 = vmatprep.subr.bf16.mxu0 %v1496_v22 }
  0x71   :  { %403 = vmatpush1.bf16.msra.mxu1 %v1495_v23  ;;  %362 = vmatpush1.bf16.msra.mxu0 %v1498_v24 }
  0x72   :  { %404 = vmatprep.subr.bf16.mxu1 %v1499_v25  ;;  %363 = vmatprep.subr.bf16.mxu0 %v1502_v27 }
  0x75   :  { %405 = vmatpush1.bf16.msra.mxu1 %v1501_v26  ;;  %364 = vmatpush1.bf16.msra.mxu0 %v1504_v29 }
  0x76   :  { %406 = vmatprep.subr.bf16.mxu1 %v1505_v28  ;;  %365 = vmatprep.subr.bf16.mxu0 %v1508_v30 }
  0x79   :  { %407 = vmatpush1.bf16.msra.mxu1 %v1507_v31  ;;  %366 = vmatpush1.bf16.msra.mxu0 %v1510_v33 }
  0x7a   :  { %1388 = vmatprep.subr.mxu1 %v1693_v35  ;;  %1368 = vmatprep.subr.bf16.mxu0 %v1693_v35 }
  0x7c   :  { %425 = vmatmul.mubr.bf16.vlgmr.msra.gmra.mrb[0].mxu1 %v94_v34  ;;  %384 = vmatmul.mubr.bf16.vlgmr.msra.gmra.mrb[0].mxu0 %v94_v34 }
  0x7d   :  { %1390 = vmatprep.mubr.msk.f32.mxu1 %vm1694_vm0, %v1693_v35  ;;  %1384 = vmatprep.mubr.msk.bf16.mxu0 %vm1694_vm0, %v1693_v35 }
  0x7e   :  { %1369 = vmatpush3.bf16.msra.mxu0 %v1511_v54 }
  0x7f   :  { %1370 = vmatprep.subr.bf16.mxu0 %v1693_v35 }
  0x82   :  { %1371 = vmatpush3.bf16.msra.mxu0 %v1512_v55 }
  0x83   :  { %1372 = vmatprep.subr.bf16.mxu0 %v1693_v35 }
  0x86   :  { %1373 = vmatpush3.bf16.msra.mxu0 %v1513_v56 }
  0x87   :  { %1374 = vmatprep.subr.bf16.mxu0 %v1693_v35 }
  0x8a   :  { %1375 = vmatpush3.bf16.msra.mxu0 %v1514_v57 }
  0x8b   :  { %1376 = vmatprep.subr.bf16.mxu0 %v1693_v35 }
  0x8e   :  { %1377 = vmatpush3.bf16.msra.mxu0 %v1515_v58 }
  0x8f   :  { %1378 = vmatprep.subr.bf16.mxu0 %v1693_v35 }
  0x92   :  { %1379 = vmatpush3.bf16.msra.mxu0 %v1516_v59 }
  0x93   :  { %1380 = vmatprep.subr.bf16.mxu0 %v1693_v35 }
  0x96   :  { %1381 = vmatpush3.bf16.msra.mxu0 %v1517_v60 }
  0x97   :  { %1382 = vmatprep.subr.bf16.mxu0 %v1693_v35 }
  0x9a   :  { %1383 = vmatpush3.bf16.msra.mxu0 %v1518_v61 }
  0x9b   :  { %1428 = vmatprep.subr.bf16.mxu0 %v1693_v35 }
  0x9d   :  { %1385 = vmatmul.mubr.bf16.vlgmr.msra.gmra.mrb[4].mxu0 %v94_v34 }
  0x9e   :  { %1444 = vmatprep.mubr.msk.bf16.mxu0 %vm1694_vm0, %v1693_v35  ;;  %1429 = vmatpush3.bf16.msra.mxu0 %v1519_v63 }
  0x9f   :  { %1430 = vmatprep.subr.bf16.mxu0 %v1693_v35 }
  0xa2   :  { %1431 = vmatpush3.bf16.msra.mxu0 %v1520_v0 }
  0xa3   :  { %1432 = vmatprep.subr.bf16.mxu0 %v1693_v35 }
 0x14f   :  { %v426_v38 = vpop.f32.mrb[0].mxu1  ;;  %v385_v45 = vpop.f32.mrb[0].mxu0 }
 0x150   :  { %v479_v40 = vmul.f32 %v478_v36, %v426_v38  ;;  %v428_v41 = vpop.f32.mrb[1].mxu1  ;;  %v474_v46 = vmul.f32 %v473_v39, %v385_v45  ;;  %v387_v48 = vpop.f32.mrb[1].mxu0 }
 0x151   :  { %v481_v43 = vmul.f32 %v480_v37, %v428_v41  ;;  %v430_v44 = vpop.f32.mrb[2].mxu1  ;;  %v476_v50 = vmul.f32 %v475_v42, %v387_v48  ;;  %v389_v51 = vpop.f32.mrb[2].mxu0 }
 0x152   :  { %v431_v47 = vpop.f32.mrb[3].mxu1  ;;  %v390_v52 = vpop.f32.mrb[3].mxu0 }
 0x153   :  { %v1834_v49 = vadd.f32 %v481_v43, %v479_v40  ;;  %v1836_v53 = vadd.f32 %v476_v50, %v474_v46 }
 0x155   :  { %1389 = vmatpush3.xpose.msk.msra.mxu1 %vm488_vm1, %v1834_v49  ;;  %652 = vrot.lane.b32.xlu1 %v1836_v53, %s1695_s4 }
 0x156   :  { %1393 = vmatprep.subr.mxu1 %v1693_v35 }
 0x158   :  { %1391 = vmatmul.mubr.msk.f32.vlgmr.msra.gmra.mrb[4].mxu1 %vm488_vm1, %v1836_v53 }
 0x159   :  { %1395 = vmatprep.mubr.msk.f32.mxu1 %vm1694_vm0, %v1693_v35 }
 0x170   :  { %v1868_v11 = vpop.f32.mrb[4].mxu0 }
 0x171   :  { %1394 = vmatpush3.msra.mxu1 %v1868_v11  ;;  %v1386_v12 = vpop.f32.mrb[5].mxu0 }
 0x172   :  { %v470_v13 = vpop.f32.mrb[6].mxu0  ;;  %1398 = vmatprep.subr.mxu1 %v1693_v35 }
 0x173   :  { %v1387_v14 = vpop.f32.mrb[7].mxu0 }
 0x1c7   :  { %v653_v18 = vpop.permute.xlu1 %652 }
 0x22b   :  { %v561_v1 = vpop.f32.mrb[4].mxu1 }
 0x22c   :  { %v565_v2 = vmul.f32 0.17677669, %v561_v1  ;;  %v1392_v3 = vpop.f32.mrb[5].mxu1 }
 0x22e   :  { %v566_v4 = vsel %vm487_vm2, %v565_v2, -inf }
 0x22f   :  { %v568_v5 = vsel %vm567_vm3, %v566_v4, -inf }
 0x230   :  { %569 = vmax.xlane.f32.xlu0 %v568_v5  ;;  %v1521_v5 = vld [vmem:[#allocation8 + $0x10] sm:$0xff]  }
 0x231   :  { %1433 = vmatpush3.bf16.msra.mxu0 %v1521_v5 }
 0x232   :  { %1434 = vmatprep.subr.bf16.mxu0 %v1693_v35 }
 0x2bd   :  { %v570_v6 = vpop.xlane.xlu0 %569 }
 0x2be   :  { %v571_v7 = vsub.f32 %v566_v4, %v570_v6  ;;  %v1522_v6 = vld [vmem:[#allocation8 + $0x18] sm:$0xff]  }
 0x2bf   :  { %1435 = vmatpush3.bf16.msra.mxu0 %v1522_v6 }
 0x2c0   :  { %v572_v8 = vmul.f32 1.442695, %v571_v7  ;;  %v1523_v7 = vld [vmem:[#allocation8 + $0x20] sm:$0xff]   ;;  %1436 = vmatprep.subr.bf16.mxu0 %v1693_v35 }
 0x2c2   :  { %1527 = vpow2.f32 %v572_v8  ;;  %v1524_v8 = vld [vmem:[#allocation8 + $0x28] sm:$0xff]  }
 0x2c3   :  { %1437 = vmatpush3.bf16.msra.mxu0 %v1523_v7 }
 0x2c4   :  { %1438 = vmatprep.subr.bf16.mxu0 %v1693_v35 }
 0x2c7   :  { %1439 = vmatpush3.bf16.msra.mxu0 %v1524_v8 }
 0x2c8   :  { %1440 = vmatprep.subr.bf16.mxu0 %v1693_v35 }
 0x2cc   :  { %v1528_v9 = vpop.eup %1527 }
 0x2cd   :  { %v574_v10 = vsel %vm567_vm3, %v1528_v9, 0.0 }
 0x2ce   :  { %575 = vadd.xlane.f32.xlu0 %v574_v10  ;;  %v1526_v10 = vld [vmem:[#allocation8 + $0x38] sm:$0xff]  }
 0x35b   :  { %v576_v15 = vpop.xlane.xlu0 %575 }
 0x35c   :  { %1529 = vrcp.f32 %v576_v15 }
 0x366   :  { %v1530_v16 = vpop.eup %1529 }
 0x367   :  { %v578_v17 = vmul.f32 %v1530_v16, %v1528_v9  ;;  %v1525_v9 = vld [vmem:[#allocation8 + $0x30] sm:$0xff]  }
 0x368   :  { %1441 = vmatpush3.bf16.msra.mxu0 %v1525_v9 }
 0x369   :  { %1396 = vmatmul.mubr.msk.f32.vlgmr.msra.gmra.mrb[6].mxu1 %vm567_vm3, %v578_v17  ;;  %1442 = vmatprep.subr.bf16.mxu0 %v1693_v35 }
 0x36a   :  { %1399 = vmatpush3.xpose.msk.msra.mxu1 %vm488_vm1, %v1834_v49  ;;  %1400 = vmatprep.mubr.msk.f32.mxu1 %vm1694_vm0, %v1693_v35 }
 0x36b   :  { %1403 = vmatprep.subr.mxu1 %v1693_v35 }
 0x36c   :  { %1443 = vmatpush3.bf16.msra.mxu0 %v1526_v10 }
 0x36d   :  { %1401 = vmatmul.mubr.msk.f32.vlgmr.msra.gmra.mrb[8].mxu1 %vm488_vm1, %v653_v18 }
 0x36e   :  { %1404 = vmatpush3.msra.mxu1 %v1868_v11  ;;  %1405 = vmatprep.mubr.msk.f32.mxu1 %vm1694_vm0, %v1693_v35 }
 0x36f   :  { %1408 = vmatprep.subr.mxu1 %v1693_v35 }
 0x43c   :  { %v1883_v19 = vpop.f32.mrb[6].mxu1 }
 0x43d   :  { %v1397_v20 = vpop.f32.mrb[7].mxu1 }
 0x440   :  { %v722_v21 = vpop.f32.mrb[8].mxu1 }
 0x441   :  { %v726_v22 = vmul.f32 0.17677669, %v722_v21  ;;  %v1402_v23 = vpop.f32.mrb[9].mxu1  ;;  %v1254_v21 = vld [vmem:[#allocation5] sm:$0xff] }
 0x443   :  { %v727_v24 = vsel %vm487_vm2, %v726_v22, -inf }
 0x444   :  { %v728_v25 = vsel %vm567_vm3, %v727_v24, -inf }
 0x445   :  { %729 = vmax.xlane.f32.xlu1 %v728_v25 }
 0x4d2   :  { %v730_v26 = vpop.xlane.xlu1 %729 }
 0x4d3   :  { %v731_v27 = vsub.f32 %v727_v24, %v730_v26 }
 0x4d5   :  { %v732_v28 = vmul.f32 1.442695, %v731_v27 }
 0x4d7   :  { %1531 = vpow2.f32 %v732_v28 }
 0x4e1   :  { %v1532_v29 = vpop.eup %1531 }
 0x4e2   :  { %v734_v30 = vsel %vm567_vm3, %v1532_v29, 0.0 }
 0x4e3   :  { %735 = vadd.xlane.f32.xlu0 %v734_v30 }
 0x4f9   :  { %812 = vrot.lane.b32.xlu0 %v1836_v53, %s1685_s1 }
 0x570   :  { %v736_v31 = vpop.xlane.xlu0 %735 }
 0x571   :  { %1533 = vrcp.f32 %v736_v31 }
 0x574   :  { %v813_v34 = vpop.permute.xlu0 %812 }
 0x57b   :  { %v1534_v32 = vpop.eup %1533 }
 0x57c   :  { %v738_v33 = vmul.f32 %v1534_v32, %v1532_v29 }
 0x57e   :  { %1406 = vmatmul.mubr.msk.f32.vlgmr.msra.gmra.mrb[10].mxu1 %vm567_vm3, %v738_v33 }
 0x57f   :  { %1409 = vmatpush3.xpose.msk.msra.mxu1 %vm488_vm1, %v1834_v49  ;;  %1410 = vmatprep.mubr.msk.f32.mxu1 %vm1694_vm0, %v1693_v35 }
 0x580   :  { %1413 = vmatprep.subr.mxu1 %v1693_v35 }
 0x582   :  { %1411 = vmatmul.mubr.msk.f32.vlgmr.msra.gmra.mrb[12].mxu1 %vm488_vm1, %v813_v34 }
 0x583   :  { %1414 = vmatpush3.msra.mxu1 %v1868_v11  ;;  %1415 = vmatprep.mubr.msk.f32.mxu1 %vm1694_vm0, %v1693_v35 }
 0x584   :  { %1418 = vmatprep.subr.mxu1 %v1693_v35 }
 0x651   :  { %v808_v36 = vpop.f32.mrb[10].mxu1 }
 0x652   :  { %v1407_v37 = vpop.f32.mrb[11].mxu1 }
 0x655   :  { %v882_v38 = vpop.f32.mrb[12].mxu1 }
 0x656   :  { %v886_v39 = vmul.f32 0.17677669, %v882_v38  ;;  %v1412_v40 = vpop.f32.mrb[13].mxu1 }
 0x658   :  { %v887_v41 = vsel %vm487_vm2, %v886_v39, -inf }
 0x659   :  { %v888_v42 = vsel %vm567_vm3, %v887_v41, -inf }
 0x65a   :  { %889 = vmax.xlane.f32.xlu0 %v888_v42 }
 0x6e7   :  { %v890_v43 = vpop.xlane.xlu0 %889 }
 0x6e8   :  { %v891_v44 = vsub.f32 %v887_v41, %v890_v43 }
 0x6ea   :  { %v892_v45 = vmul.f32 1.442695, %v891_v44 }
 0x6ec   :  { %1535 = vpow2.f32 %v892_v45 }
 0x6f6   :  { %v1536_v46 = vpop.eup %1535 }
 0x6f7   :  { %v894_v47 = vsel %vm567_vm3, %v1536_v46, 0.0 }
 0x6f8   :  { %895 = vadd.xlane.f32.xlu1 %v894_v47 }
 0x709   :  { %972 = vrot.lane.b32.xlu1 %v1836_v53, %s1696_s5 }
 0x785   :  { %v896_v48 = vpop.xlane.xlu1 %895 }
 0x786   :  { %1537 = vrcp.f32 %v896_v48 }
 0x789   :  { %v973_v52 = vpop.permute.xlu1 %972 }
 0x790   :  { %v1538_v50 = vpop.eup %1537 }
 0x791   :  { %v898_v51 = vmul.f32 %v1538_v50, %v1536_v46 }
 0x793   :  { %1416 = vmatmul.mubr.msk.f32.vlgmr.msra.gmra.mrb[14].mxu1 %vm567_vm3, %v898_v51 }
 0x794   :  { %1419 = vmatpush3.xpose.msk.msra.mxu1 %vm488_vm1, %v1834_v49  ;;  %1420 = vmatprep.mubr.msk.f32.mxu1 %vm1694_vm0, %v1693_v35 }
 0x795   :  { %1423 = vmatprep.subr.mxu1 %v1693_v35 }
 0x797   :  { %1421 = vmatmul.mubr.msk.f32.vlgmr.msra.gmra.mrb[16].mxu1 %vm488_vm1, %v973_v52 }
 0x798   :  { %1424 = vmatpush3.msra.mxu1 %v1868_v11  ;;  %1425 = vmatprep.mubr.msk.f32.mxu1 %vm1694_vm0, %v1693_v35 }
 0x866   :  { %v968_v53 = vpop.f32.mrb[14].mxu1 }
 0x867   :  { %v1417_v54 = vpop.f32.mrb[15].mxu1 }
 0x86a   :  { %v1042_v55 = vpop.f32.mrb[16].mxu1 }
 0x86b   :  { %v1046_v56 = vmul.f32 0.17677669, %v1042_v55  ;;  %v1422_v57 = vpop.f32.mrb[17].mxu1 }
 0x86d   :  { %v1047_v49 = vsel %vm487_vm2, %v1046_v56, -inf }
 0x86e   :  { %v1048_v58 = vsel %vm567_vm3, %v1047_v49, -inf }
 0x86f   :  { %1049 = vmax.xlane.f32.xlu1 %v1048_v58 }
 0x8fc   :  { %v1050_v59 = vpop.xlane.xlu1 %1049 }
 0x8fd   :  { %v1051_v60 = vsub.f32 %v1047_v49, %v1050_v59 }
 0x8ff   :  { %v1052_v61 = vmul.f32 1.442695, %v1051_v60 }
 0x901   :  { %1539 = vpow2.f32 %v1052_v61 }
 0x90b   :  { %v1540_v62 = vpop.eup %1539 }
 0x90c   :  { %v1054_v1 = vsel %vm567_vm3, %v1540_v62, 0.0 }
 0x90d   :  { %1055 = vadd.xlane.f32.xlu0 %v1054_v1 }
 0x923   :  { %1133 = vrot.lane.b32.xlu0 %v808_v36, %s1696_s5 }
 0x927   :  { %1137 = vrot.lane.b32.xlu0 %v968_v53, %s1685_s1  ;;  %s1263_s1 = sshll.u32 %s1697_s7, 4  ;;  %s1264_s1 = int_to_ptr.vmem [resolvable:$true] %s1263_s1 }
 0x928   :  { %s1653_s25 = scalar_lea.vmem %s1264_s1, 128  ;;  %p1658_p13 = scmp.lt.s32.totalorder %s1264_s1, %s1264_s1 }
 0x929   :  { %p1654_p12 = scmp.ne.s32.totalorder %s1264_s1, %s1653_s25  ;;  %p1659_p0 = scmp.lt.s32.totalorder %s1653_s25, %s1653_s25 }
 0x92b   :  { %p1660_p1 = por %p1659_p0, %p1658_p13 }
 0x92d   :  { %p1661_p2 = pnand %p1660_p1, %p1654_p12 }
 0x99a   :  { %v1056_v2 = vpop.xlane.xlu0 %1055 }
 0x99b   :  { %1541 = vrcp.f32 %v1056_v2 }
 0x99e   :  { %v1134_v13 = vpop.permute.xlu0 %1133 }
 0x99f   :  { %v1144_v15 = vsel %vm488_vm1, %v1883_v19, %v1134_v13 }
 0x9a2   :  { %v1138_v14 = vpop.permute.xlu0 %1137 }
 0x9a3   :  { %v1146_v16 = vsel %vm1145_vm4, %v1144_v15, %v1138_v14 }
 0x9a5   :  { %v1542_v3 = vpop.eup %1541 }
 0x9a6   :  { %v1058_v4 = vmul.f32 %v1542_v3, %v1540_v62 }
 0x9a8   :  { %1426 = vmatmul.mubr.msk.f32.vlgmr.msra.gmra.mrb[18].mxu1 %vm567_vm3, %v1058_v4 }
 0xa7b   :  { %v1128_v11 = vpop.f32.mrb[18].mxu1 }
 0xa7c   :  { %1141 = vrot.lane.b32.xlu0 %v1128_v11, %s1695_s4  ;;  %v1427_v12 = vpop.f32.mrb[19].mxu1 }
 0xaee   :  { %v1142_v17 = vpop.permute.xlu0 %1141 }
 0xaef   :  { %v1148_v18 = vsel %vm1147_vm5, %v1146_v16, %v1142_v17 }
 0xaf0   :  { %v1149_v20 = vpack.c.bf16 %v1148_v18, %v1148_v18 }
 0xaf2   :  { %1445 = vmatmul.mubr.bf16.vlgmr.msra.gmra.mrb[8].mxu0 %v1149_v20 }
 0xbc5   :  { %v1248_v35 = vpop.f32.mrb[8].mxu0 }
 0xbc6   :  { %v1255_v22 = vadd.f32 %v1254_v21, %v1248_v35  ;;  %v1446_v23 = vpop.f32.mrb[9].mxu0 }
 0xbc7   :  { %v1251_v24 = vpop.f32.mrb[10].mxu0 }
 0xbc8   :  { %1256 = vst [vmem:[#allocation11] sm:$0xff] %v1255_v22  ;;  %v1447_v25 = vpop.f32.mrb[11].mxu0 }
 0xbc9   :  { %1664 = shalt.err (!%p1661_p2)
}
 0xbca   :  { %s1665_s28 = scalar_lea.hbm %s1956_s8, 128 }
 0xbcb   :  { %p1666_p3 = scmp.ne.s32.totalorder %s1956_s8, %s1665_s28  ;;  %p1669_p4 = scmp.lt.u32.totalorder %s1665_s28, %s1956_s8 }
 0xbcd   :  { %p1671_p5 = pnand %p1669_p4, %p1666_p3 }
 0xbcf   :  { %1674 = shalt.err (!%p1671_p5)
}
 0xbd0   :  { %1266 = dma.vmem_to_hbm [thread:$0]  %s1264_s1, 128, %s1956_s8, [#allocation4]  }
 0xbd1   :  { %1681 = dma.done.wait [#allocation4], 128  }
 0xbd2   :  { %1682 = vsyncadd [#allocation4], 4294967168 }
 0xbd3   :  { %1270 = vsyncpa [#allocation3], 1 }
 0xbd4   :  { %1271 = vsyncpa [#allocation6], 1 }
 0xbd5   :  { %1272 = vsyncpa [#allocation9], 1 }
 0xbd6   :  { %1273 = vsyncpa [#allocation4], 1 }

</bundles_post_ra>
